<compile_context>
chip_gen: v5e
topology: v5e:2x2
jax: 0.10.0
libtpu: 0.0.40
codegen_flags: <defaults>
</compile_context>

<pallas_src>
import functools

import numpy as np
import jax
import jax.numpy as jnp
from jax.experimental import pallas as pl
from jax.experimental.pallas import tpu as pltpu


@functools.lru_cache(maxsize=1)
def _tpu_budgets():
    """(target_block_bytes, vmem_limit_bytes) appropriate for this TPU generation."""
    target_block_bytes = 4 << 20   # safe everywhere (incl. v7x's 64 MiB VMEM/TC)
    vmem_limit_bytes = 32 << 20
    try:
        info = pltpu.get_tpu_info()
        vmem_cap = int(info.vmem_capacity_bytes)
        if vmem_cap >= (96 << 20):          # v5e / v6e class: 128 MiB VMEM
            target_block_bytes = 8 << 20
            vmem_limit_bytes = 64 << 20
    except Exception:
        pass                                # unknown part -> conservative defaults
    return target_block_bytes, vmem_limit_bytes


def _make_shift_kernel(shift: int, pad_value: float, L: int):
    """Kernel on a (TR, L) row block: two direct stores (shifted copy + pad)."""
    s = int(shift)
    assert s != 0 and abs(s) < L

    def kernel(x_ref, o_ref):
        rows = o_ref.shape[0]
        if s > 0:
            # torch.roll(+s) then sseq[..., :s] = pad
            o_ref[:, s:] = x_ref[:, : L - s]
            o_ref[:, :s] = jnp.full((rows, s), pad_value, dtype=o_ref.dtype)
        else:
            a = -s
            # torch.roll(-a) then sseq[..., -a:] = pad
            o_ref[:, : L - a] = x_ref[:, a:]
            o_ref[:, L - a:] = jnp.full((rows, a), pad_value, dtype=o_ref.dtype)

    return kernel


def _choose_row_tile(R: int, L: int, itemsize: int, target_block_bytes: int) -> int:
    """Row tile: big sublane-dense blocks; >=2 balanced parallel steps when possible."""
    mult = max(8, 32 // itemsize)        # sublane quantum: f32->8, bf16->16, i8->32
    row_bytes = max(1, L * itemsize)
    rows_budget = max(mult, (target_block_bytes // row_bytes) // mult * mult)
    if R > rows_budget:
        return rows_budget               # multi-step grid; partial tail is masked
    if R <= mult:
        return R                         # single tiny block == full array dim (allowed)
    # Whole problem fits in one block: still split into >=2 balanced grid steps
    # so v7x's two TensorCores both get work (neutral on single-TC chips).
    half = -(-R // 2)                    # ceil(R / 2)
    half = -(-half // mult) * mult       # round up to the sublane quantum
    return half


@functools.lru_cache(maxsize=None)
def _build_shift_fn(shift: int, pad_value: float, B: int, D: int, L: int,
                    dtype_name: str, row_tile: int, vmem_limit_bytes: int):
    dtype = jnp.dtype(dtype_name)
    R = B * D
    kernel = _make_shift_kernel(shift, pad_value, L)
    call = pl.pallas_call(
        kernel,
        out_shape=jax.ShapeDtypeStruct((R, L), dtype),
        grid=(pl.cdiv(R, row_tile),),
        in_specs=[pl.BlockSpec((row_tile, L), lambda i: (i, 0))],
        out_specs=pl.BlockSpec((row_tile, L), lambda i: (i, 0)),
        compiler_params=pltpu.CompilerParams(
            dimension_semantics=("parallel",),
            vmem_limit_bytes=vmem_limit_bytes,
        ),
    )

    @jax.jit
    def fn(seq):                          # fuse reshape -> pallas -> reshape
        return call(seq.reshape(R, L)).reshape(B, D, L)

    return fn


def shift_sequence(seq: jax.Array, shift: int, pad_value: float = 0.25) -> jax.Array:
    """Pallas implementation of _StochasticShift.shift_sequence."""
    if seq.ndim != 3:
        raise ValueError("input sequence should be rank 3")
    if not jnp.issubdtype(seq.dtype, jnp.floating):
        # pad_value=0.25 would silently truncate for integer carriage.
        raise ValueError("shift_sequence expects a floating-point one-hot tensor")
    shift = int(shift)
    B, D, L = seq.shape
    if shift == 0:
        return seq
    if abs(shift) >= L:
        # Matches the torch reference: the pad region covers the whole sequence.
        return jnp.full_like(seq, pad_value)

    itemsize = jnp.dtype(seq.dtype).itemsize
    target_block_bytes, vmem_limit_bytes = _tpu_budgets()
    row_tile = _choose_row_tile(B * D, L, itemsize, target_block_bytes)
    fn = _build_shift_fn(shift, float(pad_value), B, D, L,
                         jnp.dtype(seq.dtype).name, row_tile, vmem_limit_bytes)
    return fn(seq)


class StochasticShift:
    """JAX/Pallas port of scvi.external.scbasset._module._StochasticShift."""

    def __init__(self, shift_max: int = 0, pad: str = "uniform", seed: int = 0):
        self.shift_max = shift_max
        self.augment_shifts = np.arange(-shift_max, shift_max + 1)
        self.pad = pad
        self.training = True
        # Host-side RNG, mirroring np.random.randint in the torch module.
        self._rng = np.random.default_rng(seed)

    def __call__(self, seq_1hot: jax.Array) -> jax.Array:
        if self.training:
            shift_i = int(self._rng.integers(0, len(self.augment_shifts)))
            shift = int(self.augment_shifts[shift_i])
            if shift != 0:
                return shift_sequence(seq_1hot, shift)
            return seq_1hot
        return seq_1hot


def _ref_shift_sequence(seq: np.ndarray, shift: int, pad_value: float = 0.25) -> np.ndarray:
    """Pure-numpy reference matching the torch implementation."""
    s = np.roll(seq, shift, axis=-1)
    if shift > 0:
        s[..., :shift] = pad_value
    else:
        s[..., shift:] = pad_value
    return s


if __name__ == "__main__":
    key = jax.random.PRNGKey(0)
    B, D, L = 2, 4, 16  # batch, one-hot depth (A/C/G/T), sequence length

    # Deterministic one-hot DNA sequence, layout [B, D, L].
    base_idx = jax.random.randint(key, (B, L), 0, D)
    seq_1hot = jnp.transpose(jax.nn.one_hot(base_idx, D, dtype=jnp.float32), (0, 2, 1))
    seq_np = np.asarray(seq_1hot)

    # Positive and negative shifts vs reference.
    for shift in (2, -3):
        out = jax.block_until_ready(shift_sequence(seq_1hot, shift))
        ref = _ref_shift_sequence(seq_np, shift)
        np.testing.assert_allclose(np.asarray(out), ref, rtol=0, atol=0)

    # Larger case: R = B*D = 64 rows -> row tile 32, 2 balanced "parallel" steps.
    B2, D2, L2 = 16, 4, 256
    idx2 = jax.random.randint(jax.random.PRNGKey(1), (B2, L2), 0, D2)
    seq2 = jnp.transpose(jax.nn.one_hot(idx2, D2, dtype=jnp.float32), (0, 2, 1))
    seq2_np = np.asarray(seq2)
    for shift in (3, -1):
        out2 = jax.block_until_ready(shift_sequence(seq2, shift))
        np.testing.assert_allclose(np.asarray(out2),
                                   _ref_shift_sequence(seq2_np, shift), rtol=0, atol=0)

    # bf16 path (kernel is dtype-agnostic; halves HBM traffic for this mem-bound op).
    out_bf16 = jax.block_until_ready(shift_sequence(seq_1hot.astype(jnp.bfloat16), 2))
    np.testing.assert_allclose(np.asarray(out_bf16).astype(np.float32),
                               _ref_shift_sequence(seq_np, 2), rtol=0, atol=0)

    # Module forward in training mode (host RNG picks the shift, as in torch).
    module = StochasticShift(shift_max=3, seed=0)
    out_train = jax.block_until_ready(module(seq_1hot))
    assert out_train.shape == seq_1hot.shape and out_train.dtype == seq_1hot.dtype

    # Eval mode: identity.
    module.training = False
    out_eval = jax.block_until_ready(module(seq_1hot))
    np.testing.assert_allclose(np.asarray(out_eval), seq_np)

    print("KERNEL_OK")
</pallas_src>

<mosaic_0001>
module attributes {stable_mosaic.version = 11 : i64} {
  func.func @kernel(%arg0: i32, %arg1: memref<8x16xf32, #tpu.memory_space<vmem>>, %arg2: memref<8x16xf32, #tpu.memory_space<vmem>>) attributes {dimension_semantics = [#tpu.dimension_semantics<parallel>], iteration_bounds = array<i64: 1>, scalar_prefetch = 0 : i64, scratch_operands = 0 : i64, tpu.core_type = #tpu.core_type<tc>, window_params = [{transform_indices = @transform_0, window_bounds = array<i64: 8, 16>}, {transform_indices = @transform_1, window_bounds = array<i64: 8, 16>}]} {
    %c0 = arith.constant 0 : index
    %c0_0 = arith.constant 0 : index
    %0 = vector.load %arg1[%c0, %c0_0] : memref<8x16xf32, #tpu.memory_space<vmem>>, vector<8x14xf32>
    %c0_1 = arith.constant 0 : index
    %c2 = arith.constant 2 : index
    %1 = vector.load %arg2[%c0_1, %c2] : memref<8x16xf32, #tpu.memory_space<vmem>>, vector<8x14xf32>
    tpu.vector_store %arg2[%c0_1, %c2], %0 {strides = array<i32>} : memref<8x16xf32, #tpu.memory_space<vmem>>, vector<8x14xf32>,
    %cst = arith.constant 2.500000e-01 : f32
    %2 = vector.broadcast %cst : f32 to vector<8x2xf32>
    %c0_2 = arith.constant 0 : index
    %c0_3 = arith.constant 0 : index
    %3 = vector.load %arg2[%c0_2, %c0_3] : memref<8x16xf32, #tpu.memory_space<vmem>>, vector<8x2xf32>
    tpu.vector_store %arg2[%c0_2, %c0_3], %2 {strides = array<i32>} : memref<8x16xf32, #tpu.memory_space<vmem>>, vector<8x2xf32>,
    return
  }
  func.func @transform_0(%arg0: i32) -> (i32, i32) {
    %c0_i32 = arith.constant 0 : i32
    %c0_i32_0 = arith.constant 0 : i32
    return %arg0, %c0_i32 : i32, i32
  }
  func.func @transform_1(%arg0: i32) -> (i32, i32) {
    %c0_i32 = arith.constant 0 : i32
    %c0_i32_0 = arith.constant 0 : i32
    return %arg0, %c0_i32 : i32, i32
  }
}

</mosaic_0001>

<bundles_post_ra>
// kernel: fn.1
= control target key start
LH: loop header
LB: loop body
LE: loop exit
PB: predicated region body
PF: predicated region fallthrough
CT: control target
= control target key end

     0   :  { %6 = vsyncpa [#allocation3], 0  ;;  %s125_s0 = inlined_call_operand.hbm [shape: f32[8,16], index: 0, kind: input, shape index: {}]   ;;  %s126_s1 = inlined_call_operand.hbm [shape: f32[8,16], index: 1, kind: output, shape index: {}]  }
   0x1   :  { %7 = vsyncpa [#allocation4], 0  ;;  %s13_s8 = sshll.u32 %s125_s0, 4  ;;  %s105_s9 = smov [#allocation2]   ;;  %s14_s8 = int_to_ptr.hbm [resolvable:$true] %s13_s8 }
   0x2   :  { %s15_s10 = sshll.u32 %s105_s9, 4  ;;  %s16_s10 = int_to_ptr.vmem [resolvable:$true] %s15_s10 }
   0x3   :  { %18 = dma.hbm_to_vmem [thread:$0]  %s14_s8, 128, %s16_s10, [#allocation3]  }
   0x4   :  { %101 = dma.done.wait [#allocation3], 128  }
   0x5   :  { %102 = vsyncadd [#allocation3], 4294967168  ;;  %v23_v0 = vld [vmem:[#allocation2] sm:$0xff]  ;;  %s106_s11 = smov 2   ;;  %s107_s12 = smov [#allocation5]   ;;  %vm28_vm0 = vcmask 130064  }
   0x6   :  { %25 = vrot.lane.b32.xlu0 %v23_v0, %s106_s11  ;;  %s37_s13 = sshll.u32 %s107_s12, 4  ;;  %s39_s16 = sshll.u32 %s126_s1, 4  ;;  %vm30_vm1 = vcmask 15360   ;;  %v108_v2 = vmov 0.25   ;;  %s38_s13 = int_to_ptr.vmem [resolvable:$true] %s37_s13  ;;  %s40_s16 = int_to_ptr.hbm [resolvable:$true] %s39_s16 }
  0x78   :  { %v26_v1 = vpop.permute.xlu0 %25 }
  0x79   :  { %29 = vst.msk [vmem:[#allocation5] sm:$0xff] %vm28_vm0, %v26_v1 }
  0x7a   :  { %31 = vst.msk [vmem:[#allocation5] sm:$0xff] %vm30_vm1, %v108_v2 }
  0x7b   :  { %42 = dma.vmem_to_hbm [thread:$0]  %s38_s13, 128, %s40_s16, [#allocation4]  }
  0x7c   :  { %103 = dma.done.wait [#allocation4], 128  }
  0x7d   :  { %104 = vsyncadd [#allocation4], 4294967168 }
  0x7e   :  { %47 = vsyncpa [#allocation3], 1 }
  0x7f   :  { %48 = vsyncpa [#allocation4], 1 }

</bundles_post_ra>
